<compile_context>
chip_gen: v7x
topology: tpu7x:2x2x1
jax: 0.10.0
libtpu: 0.0.40
codegen_flags: <defaults>
</compile_context>

<pallas_src>
import numpy as np
import jax
import jax.numpy as jnp
from jax.experimental import pallas as pl
from jax.experimental.pallas import tpu as pltpu


def basic_block_kernel(x_ref, w1_ref, s1_ref, b1_ref, w2_ref, s2_ref, b2_ref,
                       o_ref, xpad, midpad):
    # x_ref   : (1, H, L)  lane-dense packed input tile (L = W*Cp); doubles as the residual
    # w1_ref  : (3, L, L)  block-banded conv1 weights, one (L, L) matrix per row tap dy
    # w2_ref  : (3, L, L)  block-banded conv2 weights
    # s*/b*   : (1, L)     folded BN scale / shift, tiled across W positions (0 on pad lanes)
    # o_ref   : (1, H, L)  lane-dense packed output tile
    # xpad    : (H+2, L)   scratch: input rows with zero halo rows
    # midpad  : (H+2, L)   scratch: conv1 output rows with zero halo rows
    H = x_ref.shape[1]
    L = x_ref.shape[2]
    zrow = jnp.zeros((1, L), jnp.float32)

    x = x_ref[0]                                   # (H, L)

    # zero halo rows every step (cheap lane-dense single-row stores; see header note on
    # why this is not guarded by pl.when(program_id == 0)).
    xpad[0:1, :] = zrow
    xpad[H + 1:H + 2, :] = zrow
    xpad[1:H + 1, :] = x

    # ---- conv1 (3x3, stride=1, pad=1): 3 row-tap matmuls, no im2col ----
    acc1 = jnp.dot(xpad[0:H, :], w1_ref[0], preferred_element_type=jnp.float32)
    acc1 = acc1 + jnp.dot(xpad[1:H + 1, :], w1_ref[1], preferred_element_type=jnp.float32)
    acc1 = acc1 + jnp.dot(xpad[2:H + 2, :], w1_ref[2], preferred_element_type=jnp.float32)
    out1 = jnp.maximum(acc1 * s1_ref[...] + b1_ref[...], 0.0)     # BN1 + ReLU

    midpad[0:1, :] = zrow
    midpad[H + 1:H + 2, :] = zrow
    midpad[1:H + 1, :] = out1

    # ---- conv2 (3x3, stride=1, pad=1) ----
    acc2 = jnp.dot(midpad[0:H, :], w2_ref[0], preferred_element_type=jnp.float32)
    acc2 = acc2 + jnp.dot(midpad[1:H + 1, :], w2_ref[1], preferred_element_type=jnp.float32)
    acc2 = acc2 + jnp.dot(midpad[2:H + 2, :], w2_ref[2], preferred_element_type=jnp.float32)
    out2 = acc2 * s2_ref[...] + b2_ref[...]                       # BN2

    # residual add (identity residual == packed input) + ReLU; full 128-lane unmasked store
    o_ref[0] = jnp.maximum(out2 + x, 0.0)


def _band_weights(w, Cin, Cout, Cp, W):
    """PyTorch OIHW 3x3 weights -> (3, W*Cp, W*Cp) block-banded matrices (one per dy)."""
    L = W * Cp
    wt = np.asarray(w, dtype=np.float32)           # (Cout, Cin, 3, 3)
    M = np.zeros((3, L, L), np.float32)
    for dy in range(3):
        for dx in range(3):
            blk = wt[:, :, dy, dx].T               # (Cin, Cout): rows = ci, cols = co
            for wo in range(W):
                wi = wo + dx - 1                   # input column feeding output column wo
                if 0 <= wi < W:
                    M[dy, wi * Cp:wi * Cp + Cin, wo * Cp:wo * Cp + Cout] = blk
    return jnp.asarray(M)


def _bn_fold_packed(gamma, beta, mean, var, Cout, Cp, W, eps):
    """Fold BN running stats + affine -> packed (1, W*Cp) scale/shift (0 on pad lanes)."""
    s = np.asarray(gamma, np.float32) / np.sqrt(np.asarray(var, np.float32) + eps)
    b = np.asarray(beta, np.float32) - np.asarray(mean, np.float32) * s
    sv = np.zeros((Cp,), np.float32)
    bv = np.zeros((Cp,), np.float32)
    sv[:Cout] = s
    bv[:Cout] = b
    return (jnp.asarray(np.tile(sv, W)[None, :]),
            jnp.asarray(np.tile(bv, W)[None, :]))


def basic_block_forward(x_nchw, params, eps=1e-5):
    """x_nchw: (N, C, H, W) float32. stride=1, downsample=None (identity residual)."""
    w1, g1, be1, m1, v1, w2, g2, be2, m2, v2 = params
    N, C, H, W = x_nchw.shape
    Cout = w1.shape[0]
    assert w1.shape[1] == C and Cout == C, "identity residual requires planes == inplanes"

    # pad channels so the packed lane axis L = W*Cp is a multiple of 128 (lane-dense)
    Cp = C
    while (W * Cp) % 128 != 0:
        Cp += 1
    L = W * Cp

    w1b = _band_weights(w1, C, Cout, Cp, W)
    w2b = _band_weights(w2, Cout, Cout, Cp, W)
    s1, b1 = _bn_fold_packed(g1, be1, m1, v1, Cout, Cp, W, eps)
    s2, b2 = _bn_fold_packed(g2, be2, m2, v2, Cout, Cp, W, eps)

    # NCHW -> lane-dense packed (N, H, W*Cp), channel-fastest within each W position
    x_nhwc = jnp.transpose(x_nchw, (0, 2, 3, 1)).astype(jnp.float32)
    x_packed = jnp.pad(x_nhwc, ((0, 0), (0, 0), (0, 0), (0, Cp - C))).reshape(N, H, L)

    out_packed = pl.pallas_call(
        basic_block_kernel,
        out_shape=jax.ShapeDtypeStruct((N, H, L), jnp.float32),
        grid_spec=pltpu.PrefetchScalarGridSpec(
            num_scalar_prefetch=0,
            grid=(N,),
            in_specs=[
                pl.BlockSpec((1, H, L), lambda n: (n, 0, 0)),
                pl.BlockSpec((3, L, L), lambda n: (0, 0, 0)),
                pl.BlockSpec((1, L), lambda n: (0, 0)),
                pl.BlockSpec((1, L), lambda n: (0, 0)),
                pl.BlockSpec((3, L, L), lambda n: (0, 0, 0)),
                pl.BlockSpec((1, L), lambda n: (0, 0)),
                pl.BlockSpec((1, L), lambda n: (0, 0)),
            ],
            out_specs=pl.BlockSpec((1, H, L), lambda n: (n, 0, 0)),
            scratch_shapes=[
                pltpu.VMEM((H + 2, L), jnp.float32),    # zero-halo input rows
                pltpu.VMEM((H + 2, L), jnp.float32),    # zero-halo conv1 output rows
            ],
        ),
        compiler_params=pltpu.CompilerParams(
            dimension_semantics=("parallel",)),
    )(x_packed, w1b, s1, b1, w2b, s2, b2)

    out = out_packed.reshape(N, H, W, Cp)[:, :, :, :C]
    return jnp.transpose(out, (0, 3, 1, 2))   # back to NCHW


def reference_forward(x, params, eps=1e-5):
    """Pure-JAX reference (NCHW) for correctness checking."""
    w1, g1, be1, m1, v1, w2, g2, be2, m2, v2 = params

    def conv(a, w):
        return jax.lax.conv_general_dilated(
            a, w, window_strides=(1, 1), padding=((1, 1), (1, 1)),
            dimension_numbers=("NCHW", "OIHW", "NCHW"))

    def bn(a, g, b, m, v):
        sh = (1, -1, 1, 1)
        return (a - m.reshape(sh)) / jnp.sqrt(v.reshape(sh) + eps) * g.reshape(sh) + b.reshape(sh)

    out = jnp.maximum(bn(conv(x, w1), g1, be1, m1, v1), 0.0)
    out = bn(conv(out, w2), g2, be2, m2, v2)
    return jnp.maximum(out + x, 0.0)


if __name__ == "__main__":
    # BasicBlock(inplanes=4, planes=4, stride=1, downsample=None)
    N, C, H, W = 2, 4, 16, 16
    planes = C

    key = jax.random.PRNGKey(0)
    keys = jax.random.split(key, 11)

    x = jax.random.normal(keys[0], (N, C, H, W), dtype=jnp.float32)

    w1 = 0.1 * jax.random.normal(keys[1], (planes, C, 3, 3), dtype=jnp.float32)
    g1 = 1.0 + 0.1 * jax.random.normal(keys[2], (planes,), dtype=jnp.float32)
    be1 = 0.1 * jax.random.normal(keys[3], (planes,), dtype=jnp.float32)
    m1 = 0.1 * jax.random.normal(keys[4], (planes,), dtype=jnp.float32)
    v1 = 1.0 + 0.1 * jnp.abs(jax.random.normal(keys[5], (planes,), dtype=jnp.float32))

    w2 = 0.1 * jax.random.normal(keys[6], (planes, planes, 3, 3), dtype=jnp.float32)
    g2 = 1.0 + 0.1 * jax.random.normal(keys[7], (planes,), dtype=jnp.float32)
    be2 = 0.1 * jax.random.normal(keys[8], (planes,), dtype=jnp.float32)
    m2 = 0.1 * jax.random.normal(keys[9], (planes,), dtype=jnp.float32)
    v2 = 1.0 + 0.1 * jnp.abs(jax.random.normal(keys[10], (planes,), dtype=jnp.float32))

    params = (w1, g1, be1, m1, v1, w2, g2, be2, m2, v2)

    out = basic_block_forward(x, params)
    out = jax.block_until_ready(out)

    ref = jax.block_until_ready(reference_forward(x, params))
    assert out.shape == (N, C, H, W)
    assert jnp.allclose(out, ref, atol=1e-4, rtol=1e-4), \
        f"max err {jnp.max(jnp.abs(out - ref))}"

    print("KERNEL_OK")
</pallas_src>

<mosaic_0001>
module attributes {stable_mosaic.version = 11 : i64} {
  func.func @basic_block_kernel(%arg0: i32, %arg1: memref<1x16x128xf32, #tpu.memory_space<vmem>>, %arg2: memref<3x128x128xf32, #tpu.memory_space<vmem>>, %arg3: memref<1x128xf32, #tpu.memory_space<vmem>>, %arg4: memref<1x128xf32, #tpu.memory_space<vmem>>, %arg5: memref<3x128x128xf32, #tpu.memory_space<vmem>>, %arg6: memref<1x128xf32, #tpu.memory_space<vmem>>, %arg7: memref<1x128xf32, #tpu.memory_space<vmem>>, %arg8: memref<1x16x128xf32, #tpu.memory_space<vmem>>, %arg9: memref<18x128xf32, #tpu.memory_space<vmem>>, %arg10: memref<18x128xf32, #tpu.memory_space<vmem>>) attributes {dimension_semantics = [#tpu.dimension_semantics<parallel>], iteration_bounds = array<i64: 2>, scalar_prefetch = 0 : i64, scratch_operands = 2 : i64, tpu.core_type = #tpu.core_type<tc>, window_params = [{transform_indices = @transform_0, window_bounds = array<i64: 1, 16, 128>}, {pipeline_mode = #tpu.pipeline_mode<synchronous>, transform_indices = @transform_1, window_bounds = array<i64: 3, 128, 128>}, {pipeline_mode = #tpu.pipeline_mode<synchronous>, transform_indices = @transform_2, window_bounds = array<i64: 1, 128>}, {pipeline_mode = #tpu.pipeline_mode<synchronous>, transform_indices = @transform_3, window_bounds = array<i64: 1, 128>}, {pipeline_mode = #tpu.pipeline_mode<synchronous>, transform_indices = @transform_4, window_bounds = array<i64: 3, 128, 128>}, {pipeline_mode = #tpu.pipeline_mode<synchronous>, transform_indices = @transform_5, window_bounds = array<i64: 1, 128>}, {pipeline_mode = #tpu.pipeline_mode<synchronous>, transform_indices = @transform_6, window_bounds = array<i64: 1, 128>}, {transform_indices = @transform_7, window_bounds = array<i64: 1, 16, 128>}]} {
    %cst = arith.constant 0.000000e+00 : f32
    %0 = vector.broadcast %cst : f32 to vector<1x128xf32>
    %c0 = arith.constant 0 : index
    %c0_0 = arith.constant 0 : index
    %c0_1 = arith.constant 0 : index
    %1 = vector.load %arg1[%c0, %c0_0, %c0_1] : memref<1x16x128xf32, #tpu.memory_space<vmem>>, vector<1x16x128xf32>
    %2 = vector.shape_cast %1 : vector<1x16x128xf32> to vector<16x128xf32>
    %c0_2 = arith.constant 0 : index
    %c0_3 = arith.constant 0 : index
    %3 = vector.load %arg9[%c0_2, %c0_3] : memref<18x128xf32, #tpu.memory_space<vmem>>, vector<1x128xf32>
    tpu.vector_store %arg9[%c0_2, %c0_3], %0 {strides = array<i32>} : memref<18x128xf32, #tpu.memory_space<vmem>>, vector<1x128xf32>,
    %c17 = arith.constant 17 : index
    %c0_4 = arith.constant 0 : index
    %4 = vector.load %arg9[%c17, %c0_4] : memref<18x128xf32, #tpu.memory_space<vmem>>, vector<1x128xf32>
    tpu.vector_store %arg9[%c17, %c0_4], %0 {strides = array<i32>} : memref<18x128xf32, #tpu.memory_space<vmem>>, vector<1x128xf32>,
    %c1 = arith.constant 1 : index
    %c0_5 = arith.constant 0 : index
    %5 = vector.load %arg9[%c1, %c0_5] : memref<18x128xf32, #tpu.memory_space<vmem>>, vector<16x128xf32>
    tpu.vector_store %arg9[%c1, %c0_5], %2 {strides = array<i32>} : memref<18x128xf32, #tpu.memory_space<vmem>>, vector<16x128xf32>,
    %c0_6 = arith.constant 0 : index
    %c0_7 = arith.constant 0 : index
    %6 = vector.load %arg9[%c0_6, %c0_7] : memref<18x128xf32, #tpu.memory_space<vmem>>, vector<16x128xf32>
    %c0_8 = arith.constant 0 : index
    %c0_9 = arith.constant 0 : index
    %c0_10 = arith.constant 0 : index
    %7 = vector.load %arg2[%c0_8, %c0_9, %c0_10] : memref<3x128x128xf32, #tpu.memory_space<vmem>>, vector<1x128x128xf32>
    %8 = vector.shape_cast %7 : vector<1x128x128xf32> to vector<128x128xf32>
    %cst_11 = arith.constant dense<0.000000e+00> : vector<16x128xf32>
    %9 = tpu.matmul %6, %8, %cst_11 {dimension_numbers = #tpu.dot_dimension_numbers<[1], [0], [0], [1], [0, 0, 1, 1], [], []>} : vector<16x128xf32>, vector<128x128xf32>, vector<16x128xf32> -> vector<16x128xf32>
    %c1_12 = arith.constant 1 : index
    %c0_13 = arith.constant 0 : index
    %10 = vector.load %arg9[%c1_12, %c0_13] : memref<18x128xf32, #tpu.memory_space<vmem>>, vector<16x128xf32>
    %c1_14 = arith.constant 1 : index
    %c0_15 = arith.constant 0 : index
    %c0_16 = arith.constant 0 : index
    %11 = vector.load %arg2[%c1_14, %c0_15, %c0_16] : memref<3x128x128xf32, #tpu.memory_space<vmem>>, vector<1x128x128xf32>
    %12 = vector.shape_cast %11 : vector<1x128x128xf32> to vector<128x128xf32>
    %cst_17 = arith.constant dense<0.000000e+00> : vector<16x128xf32>
    %13 = tpu.matmul %10, %12, %cst_17 {dimension_numbers = #tpu.dot_dimension_numbers<[1], [0], [0], [1], [0, 0, 1, 1], [], []>} : vector<16x128xf32>, vector<128x128xf32>, vector<16x128xf32> -> vector<16x128xf32>
    %14 = arith.addf %9, %13 : vector<16x128xf32>
    %c2 = arith.constant 2 : index
    %c0_18 = arith.constant 0 : index
    %15 = vector.load %arg9[%c2, %c0_18] : memref<18x128xf32, #tpu.memory_space<vmem>>, vector<16x128xf32>
    %c2_19 = arith.constant 2 : index
    %c0_20 = arith.constant 0 : index
    %c0_21 = arith.constant 0 : index
    %16 = vector.load %arg2[%c2_19, %c0_20, %c0_21] : memref<3x128x128xf32, #tpu.memory_space<vmem>>, vector<1x128x128xf32>
    %17 = vector.shape_cast %16 : vector<1x128x128xf32> to vector<128x128xf32>
    %cst_22 = arith.constant dense<0.000000e+00> : vector<16x128xf32>
    %18 = tpu.matmul %15, %17, %cst_22 {dimension_numbers = #tpu.dot_dimension_numbers<[1], [0], [0], [1], [0, 0, 1, 1], [], []>} : vector<16x128xf32>, vector<128x128xf32>, vector<16x128xf32> -> vector<16x128xf32>
    %19 = arith.addf %14, %18 : vector<16x128xf32>
    %c0_23 = arith.constant 0 : index
    %c0_24 = arith.constant 0 : index
    %20 = vector.load %arg3[%c0_23, %c0_24] : memref<1x128xf32, #tpu.memory_space<vmem>>, vector<1x128xf32>
    %21 = vector.broadcast %20 : vector<1x128xf32> to vector<16x128xf32>
    %22 = arith.mulf %19, %21 : vector<16x128xf32>
    %c0_25 = arith.constant 0 : index
    %c0_26 = arith.constant 0 : index
    %23 = vector.load %arg4[%c0_25, %c0_26] : memref<1x128xf32, #tpu.memory_space<vmem>>, vector<1x128xf32>
    %24 = vector.broadcast %23 : vector<1x128xf32> to vector<16x128xf32>
    %25 = arith.addf %22, %24 : vector<16x128xf32>
    %cst_27 = arith.constant 0.000000e+00 : f32
    %26 = vector.broadcast %cst_27 : f32 to vector<16x128xf32>
    %27 = arith.maximumf %25, %26 : vector<16x128xf32>
    %c0_28 = arith.constant 0 : index
    %c0_29 = arith.constant 0 : index
    %28 = vector.load %arg10[%c0_28, %c0_29] : memref<18x128xf32, #tpu.memory_space<vmem>>, vector<1x128xf32>
    tpu.vector_store %arg10[%c0_28, %c0_29], %0 {strides = array<i32>} : memref<18x128xf32, #tpu.memory_space<vmem>>, vector<1x128xf32>,
    %c17_30 = arith.constant 17 : index
    %c0_31 = arith.constant 0 : index
    %29 = vector.load %arg10[%c17_30, %c0_31] : memref<18x128xf32, #tpu.memory_space<vmem>>, vector<1x128xf32>
    tpu.vector_store %arg10[%c17_30, %c0_31], %0 {strides = array<i32>} : memref<18x128xf32, #tpu.memory_space<vmem>>, vector<1x128xf32>,
    %c1_32 = arith.constant 1 : index
    %c0_33 = arith.constant 0 : index
    %30 = vector.load %arg10[%c1_32, %c0_33] : memref<18x128xf32, #tpu.memory_space<vmem>>, vector<16x128xf32>
    tpu.vector_store %arg10[%c1_32, %c0_33], %27 {strides = array<i32>} : memref<18x128xf32, #tpu.memory_space<vmem>>, vector<16x128xf32>,
    %c0_34 = arith.constant 0 : index
    %c0_35 = arith.constant 0 : index
    %31 = vector.load %arg10[%c0_34, %c0_35] : memref<18x128xf32, #tpu.memory_space<vmem>>, vector<16x128xf32>
    %c0_36 = arith.constant 0 : index
    %c0_37 = arith.constant 0 : index
    %c0_38 = arith.constant 0 : index
    %32 = vector.load %arg5[%c0_36, %c0_37, %c0_38] : memref<3x128x128xf32, #tpu.memory_space<vmem>>, vector<1x128x128xf32>
    %33 = vector.shape_cast %32 : vector<1x128x128xf32> to vector<128x128xf32>
    %cst_39 = arith.constant dense<0.000000e+00> : vector<16x128xf32>
    %34 = tpu.matmul %31, %33, %cst_39 {dimension_numbers = #tpu.dot_dimension_numbers<[1], [0], [0], [1], [0, 0, 1, 1], [], []>} : vector<16x128xf32>, vector<128x128xf32>, vector<16x128xf32> -> vector<16x128xf32>
    %c1_40 = arith.constant 1 : index
    %c0_41 = arith.constant 0 : index
    %35 = vector.load %arg10[%c1_40, %c0_41] : memref<18x128xf32, #tpu.memory_space<vmem>>, vector<16x128xf32>
    %c1_42 = arith.constant 1 : index
    %c0_43 = arith.constant 0 : index
    %c0_44 = arith.constant 0 : index
    %36 = vector.load %arg5[%c1_42, %c0_43, %c0_44] : memref<3x128x128xf32, #tpu.memory_space<vmem>>, vector<1x128x128xf32>
    %37 = vector.shape_cast %36 : vector<1x128x128xf32> to vector<128x128xf32>
    %cst_45 = arith.constant dense<0.000000e+00> : vector<16x128xf32>
    %38 = tpu.matmul %35, %37, %cst_45 {dimension_numbers = #tpu.dot_dimension_numbers<[1], [0], [0], [1], [0, 0, 1, 1], [], []>} : vector<16x128xf32>, vector<128x128xf32>, vector<16x128xf32> -> vector<16x128xf32>
    %39 = arith.addf %34, %38 : vector<16x128xf32>
    %c2_46 = arith.constant 2 : index
    %c0_47 = arith.constant 0 : index
    %40 = vector.load %arg10[%c2_46, %c0_47] : memref<18x128xf32, #tpu.memory_space<vmem>>, vector<16x128xf32>
    %c2_48 = arith.constant 2 : index
    %c0_49 = arith.constant 0 : index
    %c0_50 = arith.constant 0 : index
    %41 = vector.load %arg5[%c2_48, %c0_49, %c0_50] : memref<3x128x128xf32, #tpu.memory_space<vmem>>, vector<1x128x128xf32>
    %42 = vector.shape_cast %41 : vector<1x128x128xf32> to vector<128x128xf32>
    %cst_51 = arith.constant dense<0.000000e+00> : vector<16x128xf32>
    %43 = tpu.matmul %40, %42, %cst_51 {dimension_numbers = #tpu.dot_dimension_numbers<[1], [0], [0], [1], [0, 0, 1, 1], [], []>} : vector<16x128xf32>, vector<128x128xf32>, vector<16x128xf32> -> vector<16x128xf32>
    %44 = arith.addf %39, %43 : vector<16x128xf32>
    %c0_52 = arith.constant 0 : index
    %c0_53 = arith.constant 0 : index
    %45 = vector.load %arg6[%c0_52, %c0_53] : memref<1x128xf32, #tpu.memory_space<vmem>>, vector<1x128xf32>
    %46 = vector.broadcast %45 : vector<1x128xf32> to vector<16x128xf32>
    %47 = arith.mulf %44, %46 : vector<16x128xf32>
    %c0_54 = arith.constant 0 : index
    %c0_55 = arith.constant 0 : index
    %48 = vector.load %arg7[%c0_54, %c0_55] : memref<1x128xf32, #tpu.memory_space<vmem>>, vector<1x128xf32>
    %49 = vector.broadcast %48 : vector<1x128xf32> to vector<16x128xf32>
    %50 = arith.addf %47, %49 : vector<16x128xf32>
    %51 = arith.addf %50, %2 : vector<16x128xf32>
    %cst_56 = arith.constant 0.000000e+00 : f32
    %52 = vector.broadcast %cst_56 : f32 to vector<16x128xf32>
    %53 = arith.maximumf %51, %52 : vector<16x128xf32>
    %c0_57 = arith.constant 0 : index
    %c0_58 = arith.constant 0 : index
    %c0_59 = arith.constant 0 : index
    %54 = vector.load %arg8[%c0_57, %c0_58, %c0_59] : memref<1x16x128xf32, #tpu.memory_space<vmem>>, vector<1x16x128xf32>
    %55 = vector.shape_cast %54 : vector<1x16x128xf32> to vector<16x128xf32>
    %56 = vector.shape_cast %53 : vector<16x128xf32> to vector<1x16x128xf32>
    tpu.vector_store %arg8[%c0_57, %c0_58, %c0_59], %56 {strides = array<i32>} : memref<1x16x128xf32, #tpu.memory_space<vmem>>, vector<1x16x128xf32>,
    return
  }
  func.func @transform_0(%arg0: i32) -> (i32, i32, i32) {
    %c0_i32 = arith.constant 0 : i32
    %c0_i32_0 = arith.constant 0 : i32
    %c0_i32_1 = arith.constant 0 : i32
    return %arg0, %c0_i32, %c0_i32_0 : i32, i32, i32
  }
  func.func @transform_1(%arg0: i32) -> (i32, i32, i32) {
    %c0_i32 = arith.constant 0 : i32
    %c0_i32_0 = arith.constant 0 : i32
    %c0_i32_1 = arith.constant 0 : i32
    %c0_i32_2 = arith.constant 0 : i32
    return %c0_i32, %c0_i32_0, %c0_i32_1 : i32, i32, i32
  }
  func.func @transform_2(%arg0: i32) -> (i32, i32) {
    %c0_i32 = arith.constant 0 : i32
    %c0_i32_0 = arith.constant 0 : i32
    %c0_i32_1 = arith.constant 0 : i32
    return %c0_i32, %c0_i32_0 : i32, i32
  }
  func.func @transform_3(%arg0: i32) -> (i32, i32) {
    %c0_i32 = arith.constant 0 : i32
    %c0_i32_0 = arith.constant 0 : i32
    %c0_i32_1 = arith.constant 0 : i32
    return %c0_i32, %c0_i32_0 : i32, i32
  }
  func.func @transform_4(%arg0: i32) -> (i32, i32, i32) {
    %c0_i32 = arith.constant 0 : i32
    %c0_i32_0 = arith.constant 0 : i32
    %c0_i32_1 = arith.constant 0 : i32
    %c0_i32_2 = arith.constant 0 : i32
    return %c0_i32, %c0_i32_0, %c0_i32_1 : i32, i32, i32
  }
  func.func @transform_5(%arg0: i32) -> (i32, i32) {
    %c0_i32 = arith.constant 0 : i32
    %c0_i32_0 = arith.constant 0 : i32
    %c0_i32_1 = arith.constant 0 : i32
    return %c0_i32, %c0_i32_0 : i32, i32
  }
  func.func @transform_6(%arg0: i32) -> (i32, i32) {
    %c0_i32 = arith.constant 0 : i32
    %c0_i32_0 = arith.constant 0 : i32
    %c0_i32_1 = arith.constant 0 : i32
    return %c0_i32, %c0_i32_0 : i32, i32
  }
  func.func @transform_7(%arg0: i32) -> (i32, i32, i32) {
    %c0_i32 = arith.constant 0 : i32
    %c0_i32_0 = arith.constant 0 : i32
    %c0_i32_1 = arith.constant 0 : i32
    return %arg0, %c0_i32, %c0_i32_0 : i32, i32, i32
  }
}

</mosaic_0001>

<bundles_post_ra>
// kernel: tpu_custom_call.1
= control target key start
LH: loop header
LB: loop body
LE: loop exit
PB: predicated region body
PF: predicated region fallthrough
CT: control target
= control target key end

     0   :  { %12 = vsyncpa [#allocation5], 0  ;;  %s2142_s0 = inlined_call_operand.hbm [shape: f32[2,16,128], index: 0, kind: input, shape index: {}]   ;;  %s2143_s1 = inlined_call_operand.hbm [shape: f32[3,128,128], index: 1, kind: input, shape index: {}]   ;;  %s2144_s2 = inlined_call_operand.vmem [shape: f32[1,128], index: 2, kind: input, shape index: {}]   ;;  %s2145_s3 = inlined_call_operand.vmem [shape: f32[1,128], index: 3, kind: input, shape index: {}]   ;;  %s2146_s4 = inlined_call_operand.hbm [shape: f32[3,128,128], index: 4, kind: input, shape index: {}]   ;;  %s2147_s5 = inlined_call_operand.vmem [shape: f32[1,128], index: 5, kind: input, shape index: {}]   ;;  %s2148_s6 = inlined_call_operand.vmem [shape: f32[1,128], index: 6, kind: input, shape index: {}]   ;;  %s2149_s7 = inlined_call_operand.hbm [shape: f32[2,16,128], index: 7, kind: output, shape index: {}]  }
   0x1   :  { %14 = vsyncpa [#allocation5 + $0x1], 0 }
   0x2   :  { %15 = vsyncpa [#allocation8], 0 }
   0x3   :  { %16 = vsyncpa [#allocation6], 0 }
   0x4   :  { %18 = vsyncpa [#allocation6 + $0x1], 0  ;;  %s1873_s24 = smov 0   ;;  %s1875_s25 = smov 0  }
   0x5   :  { %s1877_s26 = smov 0   ;;  %s1879_s27 = smov 0  }
   0x6 LB: > { %s1894_s28 = sadd.s32 4294967295, %s1822_s27   ;;  %s1052_s29 = sadd.s32 4294967294, %s1822_s27   ;;  %s1822_s27 = sphi %s1879_s27, %s2171_s27   ;;  %s1818_s26 = sphi %s1877_s26, %s2170_s26   ;;  %s1814_s25 = sphi %s1875_s25, %s2169_s25   ;;  %s1810_s24 = sphi %s1873_s24, %s2168_s24  }
   0x7   : > { %p44_p0 = scmp.ne.s32.totalorder %s1814_s25, %s1810_s24  ;;  %p2150_p1 = scmp.eq.s32.totalorder %s1894_s28, 0 }
   0x8   : > { %p200_p3 = scmp.eq.s32.totalorder %s1052_s29, 1  ;;  %p1053_p5 = scmp.ge.s32.totalorder %s1822_s27, 1 }
   0x9   : > { %p1903_p4 = por %p2150_p1, %p44_p0  ;;  %p207_p7 = scmp.lt.s32.totalorder %s1822_s27, 3 }
   0xa   : > { %p1908_p6 = por %p200_p3, %p44_p0  ;;  %s1824_s10 = smov [#allocation7]  }
   0xb   : > { %s2154_s30 = scalar_select %p1903_p4, 1, 0 }
   0xc   : > { %s2155_s8 = scalar_select %p1908_p6, 1, 0 }
   0xd   : > { %p1913_p8 = pnand %p1053_p5, %p207_p7  ;;  %s219_s11 = sshll.u32 %s1824_s10, 4  ;;  %s1917_s11 = int_to_ptr.vmem [resolvable:$true] %s219_s11 }
   0xe   : > { %s1825_s13 = smov [#allocation9]   ;;  %s1666_s17 = scalar_lea.hbm %s2143_s1, 6144 }
   0xf   : > { %p1606_p9 = pneg %p1913_p8  ;;  %s238_s14 = sshll.u32 %s1825_s13, 4  ;;  %s1928_s14 = int_to_ptr.vmem [resolvable:$true] %s238_s14 }
  0x10   : > { %p1667_p12 = scmp.ne.s32.totalorder %s2143_s1, %s1666_s17  ;;  %p1673_p5 = scmp.lt.u32.totalorder %s1666_s17, %s2143_s1 }
  0x11   : > { %p1924_p11 = pnand %p1606_p9, %p2150_p1 }
  0x13   : > { %p1668_p13 = pneg %p1924_p11 }
  0x15   : > { %p1669_p0 = pnand %p1668_p13, %p1667_p12 }
  0x17   : > { %p1670_p3 = pneg %p1669_p0 }
  0x19   : > { %p1675_p7 = pnand %p1673_p5, %p1670_p3 }
  0x1b   : > { %1678 = shalt.err (!%p1675_p7)
}
  0x1c   : > { %s1679_s22 = scalar_lea.vmem %s1917_s11, 6144  ;;  %p1687_p2 = scmp.lt.s32.totalorder %s1917_s11, %s1917_s11 }
  0x1d   : > { %p1680_p9 = scmp.ne.s32.totalorder %s1917_s11, %s1679_s22  ;;  %p1688_p12 = scmp.lt.s32.totalorder %s1679_s22, %s1679_s22 }
  0x1f   : > { %p1682_p10 = pnand %p1680_p9, %p1668_p13  ;;  %p1689_p0 = por %p1688_p12, %p1687_p2 }
  0x21   : > { %p1683_p1 = pneg %p1682_p10 }
  0x23   : > { %p1690_p6 = pnand %p1689_p0, %p1683_p1 }
  0x25   : > { %1693 = shalt.err (!%p1690_p6)
}
  0x26   : > { %s2151_s23 = smov 128   ;;  %s1827_s29 = smov 8  }
  0x27   : > { %1609 = dma.hbm_to_vmem [thread:$0]  (!%p1924_p11), %s2143_s1, 6144, %s1917_s11, [#allocation8], %s2151_s23, %s2151_s23, %s1827_s29  }
  0x28   : > { %s1694_s17 = scalar_lea.hbm %s2146_s4, 6144 }
  0x29   : > { %p1695_p1 = scmp.ne.s32.totalorder %s2146_s4, %s1694_s17  ;;  %p1701_p10 = scmp.lt.u32.totalorder %s1694_s17, %s2146_s4 }
  0x2b   : > { %p1697_p2 = pnand %p1695_p1, %p1668_p13 }
  0x2d   : > { %p1698_p6 = pneg %p1697_p2 }
  0x2f   : > { %p1703_p3 = pnand %p1701_p10, %p1698_p6 }
  0x31   : > { %1706 = shalt.err (!%p1703_p3)
}
  0x32   : > { %s1707_s11 = scalar_lea.vmem %s1928_s14, 6144  ;;  %p1715_p12 = scmp.lt.s32.totalorder %s1928_s14, %s1928_s14 }
  0x33   : > { %p1708_p5 = scmp.ne.s32.totalorder %s1928_s14, %s1707_s11  ;;  %p1716_p0 = scmp.lt.s32.totalorder %s1707_s11, %s1707_s11 }
  0x35   : > { %p1710_p7 = pnand %p1708_p5, %p1668_p13  ;;  %p1717_p1 = por %p1716_p0, %p1715_p12 }
  0x37   : > { %p1711_p9 = pneg %p1710_p7 }
  0x39   : > { %p1718_p2 = pnand %p1717_p1, %p1711_p9 }
  0x3b   : > { %1721 = shalt.err (!%p1718_p2)
}
  0x3c   : > { %1612 = dma.hbm_to_vmem [thread:$0]  (!%p1924_p11), %s2146_s4, 6144, %s1928_s14, [#allocation8], %s2151_s23, %s2151_s23, %s1827_s29  }
  0x3d   : > { %s1989_s12 = sadd.s32 1, %s1822_s27   ;;  %s31_s13 = sadd.s32 1, %s1818_s26 }
  0x3e   : > { %s28_s15 = ssub.s32 %s1822_s27, %s1989_s12  ;;  %p38_p13 = scmp.ne.s32.totalorder %s1818_s26, %s1814_s25 }
  0x3f   : > { %p29_p6 = scmp.eq.s32.totalorder %s28_s15, 0  ;;  %p39_p10 = scmp.eq.s32.totalorder %s1822_s27, 0 }
  0x40   : > { %p2158_p3 = scmp.eq.s32.totalorder %s1894_s28, 1  ;;  %p1623_p7 = scmp.lt.s32.totalorder %s1822_s27, 2 }
  0x41   : > { %s2005_s17 = scalar_select %p29_p6, %s1818_s26, %s31_s13  }
  0x42   : > { %p1999_p5 = por %p2158_p3, %p38_p13  ;;  %p40_p9 = por %p39_p10, %p38_p13 }
  0x43   : > { %s258_s18 = sand.u32 1, %s1818_s26   ;;  %s1074_s14 = sshll.u32 %s1822_s27, 8 }
  0x44   : > { %s2159_s16 = scalar_select %p1999_p5, 1, 0 }
  0x45   : > { %s1057_s19 = sshll.u32 %s258_s18, 4  ;;  %s2012_s11 = scalar_lea.hbm %s2142_s0, %s1074_s14 }
  0x46   : > { %s262_s22 = scalar_lea.vmem [#allocation4], %s1057_s19  ;;  %p2016_p11 = pnand %p1623_p7, %p40_p9 }
  0x47   : > { %s269_s10 = sshll.u32 %s262_s22, 4  ;;  %s2020_s15 = scalar_lea.sflag [#allocation5], %s258_s18  ;;  %s2014_s10 = int_to_ptr.vmem [resolvable:$true] %s269_s10 }
  0x48   : > { %s1722_s23 = scalar_lea.hbm %s2012_s11, 256  ;;  %p1724_p0 = pneg %p2016_p11 }
  0x49   : > { %p1723_p12 = scmp.ne.s32.totalorder %s2012_s11, %s1722_s23  ;;  %s1727_s20 = scalar_lea.hbm %s2142_s0, 512 }
  0x4a   : > { %p1728_p13 = scmp.lt.u32.totalorder %s2012_s11, %s2142_s0  ;;  %p1729_p6 = scmp.lt.u32.totalorder %s1727_s20, %s1722_s23 }
  0x4b   : > { %p1725_p1 = pnand %p1724_p0, %p1723_p12  ;;  %p1731_p3 = scmp.lt.u32.totalorder %s1722_s23, %s2012_s11 }
  0x4c   : > { %p1730_p10 = por %p1729_p6, %p1728_p13 }
  0x4d   : > { %p1726_p2 = pneg %p1725_p1 }
  0x4e   : > { %p1732_p7 = por %p1731_p3, %p1730_p10 }
  0x50   : > { %p1733_p9 = pnand %p1732_p7, %p1726_p2 }
  0x52   : > { %1736 = shalt.err (!%p1733_p9)
}
  0x53   : > { %s1737_s18 = scalar_lea.vmem %s2014_s10, 256  ;;  %s1828_s19 = smov [#allocation4]  }
  0x54   : > { %p1738_p12 = scmp.ne.s32.totalorder %s2014_s10, %s1737_s18  ;;  %s1742_s14 = sshll.u32 %s1828_s19, 4  ;;  %s1743_s14 = int_to_ptr.vmem [resolvable:$false] %s1742_s14 }
  0x55   : > { %s1744_s21 = scalar_lea.vmem %s1743_s14, 512  ;;  %p1745_p4 = scmp.lt.s32.totalorder %s2014_s10, %s1743_s14 }
  0x56   : > { %p1740_p1 = pnand %p1738_p12, %p1724_p0  ;;  %p1746_p13 = scmp.lt.s32.totalorder %s1744_s21, %s1737_s18 }
  0x58   : > { %p1741_p5 = pneg %p1740_p1  ;;  %p1747_p6 = por %p1746_p13, %p1745_p4 }
  0x5a   : > { %p1748_p10 = pnand %p1747_p6, %p1741_p5 }
  0x5c   : > { %1751 = shalt.err (!%p1748_p10)
}
  0x5d   : > { %s2161_s23 = smov 128   ;;  %281 = sbr.rel (%p1913_p8) target bundleno = 723 (0x2d3), region = 48 }
  0x5e   : > { %1616 = dma.hbm_to_vmem [thread:$0]  (!%p2016_p11), %s2012_s11, 256, %s2014_s10, %s2020_s15, %s2161_s23, %s2161_s23, %s1827_s29  }
  0x5f   : > { %s2054_s20 = sand.u32 (!%p1913_p8), 1, %s1814_s25   ;;  %p2162_p4 = scmp.ne.s32.totalorder (!%p1913_p8), %s2154_s30, 0 }
  0x60   : > { %s1061_s22 = sshll.u32 (!%p1913_p8), %s2054_s20, 4  ;;  %s284_s18 = scalar_lea.sflag (!%p1913_p8), [#allocation5], %s2054_s20 }
  0x61   : > { %s287_s13 = scalar_lea.vmem (!%p1913_p8), [#allocation4], %s1061_s22 }
  0x64   : > { %1797 = dma.done.wait (%p2162_p4), %s284_s18, 256  }
  0x65   : > { %1799 = vsyncadd (%p2162_p4), %s284_s18, 4294967040  ;;  %p2163_p5 = scmp.eq.s32.totalorder %s1894_s28, 0 }
  0x67   : > { %1801 = dma.done.wait (%p2163_p5), [#allocation8], 12288   ;;  %p2164_p8 = pmov %p2163_p5 }
  0x68   : > { %v1829_v0 = vmov 0.0   ;;  %v353_v1 = vld [vmem:[#allocation7 + $0x80] sm:$0xff]  ;;  %v354_v2 = vld [vmem:[#allocation7 + $0x88] sm:$0xff]  ;;  %v355_v3 = vld [vmem:[#allocation7 + $0x90] sm:$0xff]  ;;  %s325_s21 = scalar_lea.vmem [#allocation10], %s1061_s22  ;;  %s1075_s18 = sshll.u32 %s1894_s28, 8 }
  0x69   : > { %1803 = vsyncadd (%p2164_p8), [#allocation8], 4294955008  ;;  %328 = vst [vmem:[#allocation2] sm:$0x1] %v1829_v0  ;;  %v1394_v4 = vpack.c.bf16 %v354_v2, %v353_v1  ;;  %v356_v5 = vld [vmem:[#allocation7 + $0x98] sm:$0xff]  ;;  %v357_v7 = vld [vmem:[#allocation7 + $0xa0] sm:$0xff]  ;;  %s2098_s9 = scalar_lea.hbm %s2149_s7, %s1075_s18 }
  0x6a   : > { %329 = vst [vmem:[#allocation2 + $0x11] sm:$0x1] %v1829_v0  ;;  %635 = vst [vmem:[#allocation3] sm:$0x1] %v1829_v0  ;;  %v1398_v6 = vpack.c.bf16 %v356_v5, %v355_v3  ;;  %v358_v8 = vld [vmem:[#allocation7 + $0xa8] sm:$0xff]  ;;  %v2068_v10 = vld [vmem:[%s287_s13] sm:$0xff] }
  0x6b   : > { %636 = vst [vmem:[#allocation3 + $0x11] sm:$0x1] %v1829_v0  ;;  %1395 = vmatprep.subr.bf16.mxu0 %v1394_v4  ;;  %v1402_v9 = vpack.c.bf16 %v358_v8, %v357_v7  ;;  %v359_v11 = vld [vmem:[#allocation7 + $0xb0] sm:$0xff]  ;;  %v360_v12 = vld [vmem:[#allocation7 + $0xb8] sm:$0xff]  ;;  %330 = vst [vmem:[#allocation2 + $0x1] sm:$0xff] %v2068_v10  ;;  %1216 = vmatprep.mubr.f32.mxu0 %v2068_v10  ;;  %s960_s23 = sshll.u32 %s325_s21, 4  ;;  %s2092_s23 = int_to_ptr.vmem [resolvable:$true] %s960_s23 }
  0x6c   : > { %1397 = vmatpush3.bf16.msra.mxu0 %v1394_v4  ;;  %v2072_v13 = vld [vmem:[%s287_s13 + $0x8] sm:$0xff]  ;;  %v1406_v14 = vpack.c.bf16 %v360_v12, %v359_v11  ;;  %v361_v15 = vld [vmem:[#allocation7 + $0xc0] sm:$0xff]  ;;  %v363_v18 = vld [vmem:[#allocation7 + $0xd0] sm:$0xff]  ;;  %s947_s22 = scalar_lea.sflag [#allocation6], %s2054_s20  ;;  %s1752_s28 = scalar_lea.vmem %s2092_s23, 256 }
  0x6d   : > { %1399 = vmatprep.subr.bf16.mxu0 %v1398_v6  ;;  %331 = vst [vmem:[#allocation2 + $0x9] sm:$0xff] %v2072_v13  ;;  %v362_v16 = vld [vmem:[#allocation7 + $0xc8] sm:$0xff]  ;;  %v364_v19 = vld [vmem:[#allocation7 + $0xd8] sm:$0xff]  ;;  %v365_v21 = vld [vmem:[#allocation7 + $0xe0] sm:$0xff]  ;;  %p1753_p11 = scmp.ne.s32.totalorder %s2092_s23, %s1752_s28  ;;  %p2165_p0 = scmp.ne.s32.totalorder %s2159_s16, 0 }
  0x6e   : > { %v1410_v17 = vpack.c.bf16 %v362_v16, %v361_v15  ;;  %v1414_v20 = vpack.c.bf16 %v364_v19, %v363_v18  ;;  %v366_v22 = vld [vmem:[#allocation7 + $0xe8] sm:$0xff]  ;;  %v660_v23 = vld [vmem:[#allocation9 + $0x80] sm:$0xff]  ;;  %v662_v25 = vld [vmem:[#allocation9 + $0x90] sm:$0xff]  ;;  %s1830_s29 = smov [#allocation10]  }
  0x6f   : > { %v661_v24 = vld [vmem:[#allocation9 + $0x88] sm:$0xff]  ;;  %v663_v27 = vld [vmem:[#allocation9 + $0x98] sm:$0xff]  ;;  %v664_v29 = vld [vmem:[#allocation9 + $0xa0] sm:$0xff]  ;;  %v1418_v31 = vpack.c.bf16 %v366_v22, %v365_v21  ;;  %p1754_p2 = pnand %p1753_p11, %p2165_p0  ;;  %s1756_s11 = sshll.u32 %s1830_s29, 4  ;;  %s1757_s11 = int_to_ptr.vmem [resolvable:$false] %s1756_s11 }
  0x70   : > { %1401 = vmatpush3.bf16.msra.mxu0 %v1398_v6  ;;  %v1490_v26 = vpack.c.bf16 %v661_v24, %v660_v23  ;;  %v1494_v28 = vpack.c.bf16 %v663_v27, %v662_v25  ;;  %v665_v30 = vld [vmem:[#allocation9 + $0xa8] sm:$0xff]  ;;  %v367_v32 = vld [vmem:[#allocation7 + $0xf0] sm:$0xff]  ;;  %v368_v33 = vld [vmem:[#allocation7 + $0xf8] sm:$0xff]  ;;  %s1758_s10 = scalar_lea.vmem %s1757_s11, 512  ;;  %p1759_p7 = scmp.lt.s32.totalorder %s2092_s23, %s1757_s11 }
  0x71   : > { %1403 = vmatprep.subr.bf16.mxu0 %v1402_v9  ;;  %v1498_v34 = vpack.c.bf16 %v665_v30, %v664_v29  ;;  %v666_v35 = vld [vmem:[#allocation9 + $0xb0] sm:$0xff]  ;;  %v667_v36 = vld [vmem:[#allocation9 + $0xb8] sm:$0xff]  ;;  %v1422_v37 = vpack.c.bf16 %v368_v33, %v367_v32  ;;  %v334_v38 = vld [vmem:[#allocation7] sm:$0xff]  ;;  %p1755_p3 = pneg %p1754_p2  ;;  %p1760_p9 = scmp.lt.s32.totalorder %s1758_s10, %s1752_s28 }
  0x72   : > { %1491 = vmatprep.subr.bf16.mxu1 %v1490_v26  ;;  %v335_v39 = vld [vmem:[#allocation7 + $0x8] sm:$0xff]  ;;  %v1502_v40 = vpack.c.bf16 %v667_v36, %v666_v35  ;;  %v336_v42 = vld [vmem:[#allocation7 + $0x10] sm:$0xff]  ;;  %v337_v43 = vld [vmem:[#allocation7 + $0x18] sm:$0xff] }
  0x73   : > { %1493 = vmatpush3.bf16.msra.mxu1 %v1490_v26  ;;  %v1426_v41 = vpack.c.bf16 %v335_v39, %v334_v38  ;;  %v1430_v44 = vpack.c.bf16 %v337_v43, %v336_v42  ;;  %v332_v45 = vld [vmem:[#allocation2] sm:$0xff]  ;;  %v338_v46 = vld [vmem:[#allocation7 + $0x20] sm:$0xff]  ;;  %v339_v47 = vld [vmem:[#allocation7 + $0x28] sm:$0xff]  ;;  %p1761_p12 = por %p1760_p9, %p1759_p7 }
  0x74   : > { %1405 = vmatpush3.bf16.msra.mxu0 %v1402_v9  ;;  %1495 = vmatprep.subr.bf16.mxu1 %v1494_v28  ;;  %v1434_v48 = vpack.c.bf16 %v339_v47, %v338_v46  ;;  %v340_v49 = vld [vmem:[#allocation7 + $0x30] sm:$0xff]  ;;  %v341_v50 = vld [vmem:[#allocation7 + $0x38] sm:$0xff]  ;;  %v342_v52 = vld [vmem:[#allocation7 + $0x40] sm:$0xff] }
  0x75   : > { %1407 = vmatprep.subr.bf16.mxu0 %v1406_v14  ;;  %v1438_v51 = vpack.c.bf16 %v341_v50, %v340_v49  ;;  %v343_v53 = vld [vmem:[#allocation7 + $0x48] sm:$0xff]  ;;  %v344_v55 = vld [vmem:[#allocation7 + $0x50] sm:$0xff]  ;;  %v345_v56 = vld [vmem:[#allocation7 + $0x58] sm:$0xff]  ;;  %p1762_p1 = pnand %p1761_p12, %p1755_p3 }
  0x76   : > { %v1442_v54 = vpack.c.bf16 %v343_v53, %v342_v52  ;;  %v1446_v57 = vpack.c.bf16 %v345_v56, %v344_v55  ;;  %v346_v58 = vld [vmem:[#allocation7 + $0x60] sm:$0xff]  ;;  %v347_v59 = vld [vmem:[#allocation7 + $0x68] sm:$0xff]  ;;  %v348_v61 = vld [vmem:[#allocation7 + $0x70] sm:$0xff] }
  0x77   : > { %1497 = vmatpush3.bf16.msra.mxu1 %v1494_v28  ;;  %v1450_v60 = vpack.c.bf16 %v347_v59, %v346_v58  ;;  %v349_v62 = vld [vmem:[#allocation7 + $0x78] sm:$0xff]  ;;  %v522_v0 = vld [vmem:[#allocation7 + $0x100] sm:$0xff]  ;;  %v523_v1 = vld [vmem:[#allocation7 + $0x108] sm:$0xff] }
  0x78   : > { %1409 = vmatpush3.bf16.msra.mxu0 %v1406_v14  ;;  %1499 = vmatprep.subr.bf16.mxu1 %v1498_v34  ;;  %v1454_v63 = vpack.c.bf16 %v349_v62, %v348_v61  ;;  %v1458_v2 = vpack.c.bf16 %v523_v1, %v522_v0  ;;  %v524_v3 = vld [vmem:[#allocation7 + $0x110] sm:$0xff]  ;;  %v525_v4 = vld [vmem:[#allocation7 + $0x118] sm:$0xff]  ;;  %v526_v8 = vld [vmem:[#allocation7 + $0x120] sm:$0xff] }
  0x79   : > { %1411 = vmatprep.subr.bf16.mxu0 %v1410_v17  ;;  %v333_v5 = vld [vmem:[#allocation2 + $0x8] sm:$0xff]  ;;  %v1462_v6 = vpack.c.bf16 %v525_v4, %v524_v3  ;;  %v527_v9 = vld [vmem:[#allocation7 + $0x128] sm:$0xff]  ;;  %v528_v12 = vld [vmem:[#allocation7 + $0x130] sm:$0xff] }
  0x7a   : > { %v519_v7 = vld [vmem:[#allocation2 + $0x2] sm:$0xff]  ;;  %v1466_v11 = vpack.c.bf16 %v527_v9, %v526_v8  ;;  %v530_v16 = vld [vmem:[#allocation7 + $0x140] sm:$0xff]  ;;  %v535_v23 = vld [vmem:[#allocation7 + $0x168] sm:$0xff] }
  0x7b   : > { %1501 = vmatpush3.bf16.msra.mxu1 %v1498_v34  ;;  %v529_v14 = vld [vmem:[#allocation7 + $0x138] sm:$0xff]  ;;  %v532_v19 = vld [vmem:[#allocation7 + $0x150] sm:$0xff]  ;;  %v534_v22 = vld [vmem:[#allocation7 + $0x160] sm:$0xff] }
  0x7c   : > { %1413 = vmatpush3.bf16.msra.mxu0 %v1410_v17  ;;  %1503 = vmatprep.subr.bf16.mxu1 %v1502_v40  ;;  %v1470_v15 = vpack.c.bf16 %v529_v14, %v528_v12  ;;  %v531_v17 = vld [vmem:[#allocation7 + $0x148] sm:$0xff]  ;;  %v1482_v24 = vpack.c.bf16 %v535_v23, %v534_v22  ;;  %v536_v25 = vld [vmem:[#allocation7 + $0x170] sm:$0xff]  ;;  %v537_v26 = vld [vmem:[#allocation7 + $0x178] sm:$0xff] }
  0x7d   : > { %1415 = vmatprep.subr.bf16.mxu0 %v1414_v20  ;;  %v1474_v18 = vpack.c.bf16 %v531_v17, %v530_v16  ;;  %v1486_v27 = vpack.c.bf16 %v537_v26, %v536_v25  ;;  %v520_v28 = vld [vmem:[#allocation2 + $0xa] sm:$0xff]  ;;  %v669_v30 = vld [vmem:[#allocation9 + $0xc8] sm:$0xff]  ;;  %v670_v32 = vld [vmem:[#allocation9 + $0xd0] sm:$0xff] }
  0x7e   : > { %v668_v29 = vld [vmem:[#allocation9 + $0xc0] sm:$0xff]  ;;  %v671_v33 = vld [vmem:[#allocation9 + $0xd8] sm:$0xff]  ;;  %v673_v36 = vld [vmem:[#allocation9 + $0xe8] sm:$0xff] }
  0x7f   : > { %1505 = vmatpush3.bf16.msra.mxu1 %v1502_v40  ;;  %v1510_v34 = vpack.c.bf16 %v671_v33, %v670_v32  ;;  %v672_v35 = vld [vmem:[#allocation9 + $0xe0] sm:$0xff]  ;;  %v674_v38 = vld [vmem:[#allocation9 + $0xf0] sm:$0xff]  ;;  %v675_v39 = vld [vmem:[#allocation9 + $0xf8] sm:$0xff] }
  0x80   : > { %1417 = vmatpush3.bf16.msra.mxu0 %v1414_v20  ;;  %v533_v20 = vld [vmem:[#allocation7 + $0x158] sm:$0xff]  ;;  %v1518_v40 = vpack.c.bf16 %v675_v39, %v674_v38  ;;  %v642_v42 = vld [vmem:[#allocation9 + $0x8] sm:$0xff]  ;;  %v1066_v46 = vld [vmem:[%s2145_s3] ss:$0 sm:$0xff] }
  0x81   : > { %1419 = vmatprep.subr.bf16.mxu0 %v1418_v31  ;;  %v1478_v21 = vpack.c.bf16 %v533_v20, %v532_v19  ;;  %v643_v52 = vld [vmem:[#allocation9 + $0x10] sm:$0xff]  ;;  %v644_v53 = vld [vmem:[#allocation9 + $0x18] sm:$0xff]  ;;  %v646_v58 = vld [vmem:[#allocation9 + $0x28] sm:$0xff] }
  0x82   : > { %v1526_v56 = vpack.c.bf16 %v644_v53, %v643_v52  ;;  %v648_v61 = vld [vmem:[#allocation9 + $0x38] sm:$0xff]  ;;  %v649_v0 = vld [vmem:[#allocation9 + $0x40] sm:$0xff]  ;;  %v650_v1 = vld [vmem:[#allocation9 + $0x48] sm:$0xff] }
  0x83   : > { %v651_v3 = vld [vmem:[#allocation9 + $0x50] sm:$0xff]  ;;  %v652_v4 = vld [vmem:[#allocation9 + $0x58] sm:$0xff]  ;;  %v829_v14 = vld [vmem:[#allocation9 + $0x100] sm:$0xff] }
  0x84   : > { %1421 = vmatpush3.bf16.msra.mxu0 %v1418_v31  ;;  %v1506_v31 = vpack.c.bf16 %v669_v30, %v668_v29  ;;  %v655_v9 = vld [vmem:[#allocation9 + $0x70] sm:$0xff]  ;;  %v834_v22 = vld [vmem:[#allocation9 + $0x128] sm:$0xff]  ;;  %v836_v26 = vld [vmem:[#allocation9 + $0x138] sm:$0xff] }
  0x85   : > { %1423 = vmatprep.subr.bf16.mxu0 %v1422_v37  ;;  %v831_v17 = vld [vmem:[#allocation9 + $0x110] sm:$0xff]  ;;  %v838_v29 = vld [vmem:[#allocation9 + $0x148] sm:$0xff]  ;;  %v840_v32 = vld [vmem:[#allocation9 + $0x158] sm:$0xff] }
  0x86   : > { %1507 = vmatprep.subr.bf16.mxu1 %v1506_v31  ;;  %v835_v25 = vld [vmem:[#allocation9 + $0x130] sm:$0xff]  ;;  %v844_v38 = vld [vmem:[#allocation9 + $0x178] sm:$0xff] }
  0x87   : > { %1509 = vmatpush3.bf16.msra.mxu1 %v1506_v31  ;;  %v839_v31 = vld [vmem:[#allocation9 + $0x150] sm:$0xff] }
  0x88   : > { %1425 = vmatpush3.bf16.msra.mxu0 %v1422_v37  ;;  %1511 = vmatprep.subr.bf16.mxu1 %v1510_v34  ;;  %v1514_v37 = vpack.c.bf16 %v673_v36, %v672_v35  ;;  %v1574_v33 = vpack.c.bf16 %v840_v32, %v839_v31  ;;  %v842_v35 = vld [vmem:[#allocation9 + $0x168] sm:$0xff] }
  0x89   : > { %1427 = vmatprep.subr.bf16.mxu0 %v1426_v41 }
  0x8b   : > { %1217 = vmatmul.mubr.f32.vlgmr.msra.gmra.mrb[0].mxu0 %v2072_v13  ;;  %1513 = vmatpush3.bf16.msra.mxu1 %v1510_v34  ;;  %v841_v34 = vld [vmem:[#allocation9 + $0x160] sm:$0xff] }
  0x8c   : > { %1429 = vmatpush3.bf16.msra.mxu0 %v1426_v41  ;;  %1251 = vmatprep.mubr.f32.mxu0 %v332_v45  ;;  %v641_v41 = vld [vmem:[#allocation9] sm:$0xff]  ;;  %v1578_v36 = vpack.c.bf16 %v842_v35, %v841_v34 }
  0x8d   : > { %1431 = vmatprep.subr.bf16.mxu0 %v1430_v44  ;;  %1515 = vmatprep.subr.bf16.mxu1 %v1514_v37  ;;  %v1522_v43 = vpack.c.bf16 %v642_v42, %v641_v41  ;;  %v1067_v41 = vld [vmem:[%s2147_s5] ss:$0 sm:$0xff] }
  0x8f   : > { %1517 = vmatpush3.bf16.msra.mxu1 %v1514_v37  ;;  %v843_v37 = vld [vmem:[#allocation9 + $0x170] sm:$0xff] }
  0x90   : > { %1433 = vmatpush3.bf16.msra.mxu0 %v1430_v44  ;;  %1519 = vmatprep.subr.bf16.mxu1 %v1518_v40  ;;  %v1065_v44 = vld [vmem:[%s2144_s2] ss:$0 sm:$0xff]  ;;  %v1582_v39 = vpack.c.bf16 %v844_v38, %v843_v37 }
  0x91   : > { %1435 = vmatprep.subr.bf16.mxu0 %v1434_v48 }
  0x93   : > { %1521 = vmatpush3.bf16.msra.mxu1 %v1518_v40 }
  0x94   : > { %1437 = vmatpush3.bf16.msra.mxu0 %v1434_v48  ;;  %1523 = vmatprep.subr.bf16.mxu1 %v1522_v43 }
  0x95   : > { %1439 = vmatprep.subr.bf16.mxu0 %v1438_v51 }
  0x98   : > { %1441 = vmatpush3.bf16.msra.mxu0 %v1438_v51 }
  0x99   : > { %1443 = vmatprep.subr.bf16.mxu0 %v1442_v54 }
  0x9c   : > { %1445 = vmatpush3.bf16.msra.mxu0 %v1442_v54 }
  0x9d   : > { %1447 = vmatprep.subr.bf16.mxu0 %v1446_v57 }
  0xa0   : > { %1449 = vmatpush3.bf16.msra.mxu0 %v1446_v57  ;;  %v645_v57 = vld [vmem:[#allocation9 + $0x20] sm:$0xff] }
  0xa1   : > { %1451 = vmatprep.subr.bf16.mxu0 %v1450_v60  ;;  %v1530_v59 = vpack.c.bf16 %v646_v58, %v645_v57 }
  0xa4   : > { %1453 = vmatpush3.bf16.msra.mxu0 %v1450_v60  ;;  %v647_v60 = vld [vmem:[#allocation9 + $0x30] sm:$0xff] }
  0xa5   : > { %1455 = vmatprep.subr.bf16.mxu0 %v1454_v63 }
  0xa8   : > { %1457 = vmatpush3.bf16.msra.mxu0 %v1454_v63  ;;  %v1534_v63 = vpack.c.bf16 %v648_v61, %v647_v60 }
  0xa9   : > { %1459 = vmatprep.subr.bf16.mxu0 %v1458_v2 }
  0xab   : > { %1252 = vmatmul.mubr.f32.vlgmr.msra.gmra.mrb[0].mxu0 %v333_v5  ;;  %v1542_v5 = vpack.c.bf16 %v652_v4, %v651_v3 }
  0xac   : > { %1461 = vmatpush3.bf16.msra.mxu0 %v1458_v2  ;;  %1286 = vmatprep.mubr.f32.mxu0 %v519_v7  ;;  %v1538_v2 = vpack.c.bf16 %v650_v1, %v649_v0  ;;  %v654_v7 = vld [vmem:[#allocation9 + $0x68] sm:$0xff] }
  0xad   : > { %1463 = vmatprep.subr.bf16.mxu0 %v1462_v6 }
  0xb0   : > { %1465 = vmatpush3.bf16.msra.mxu0 %v1462_v6  ;;  %v653_v6 = vld [vmem:[#allocation9 + $0x60] sm:$0xff] }
  0xb1   : > { %1467 = vmatprep.subr.bf16.mxu0 %v1466_v11  ;;  %v1546_v8 = vpack.c.bf16 %v654_v7, %v653_v6 }
  0xb4   : > { %1469 = vmatpush3.bf16.msra.mxu0 %v1466_v11  ;;  %v656_v11 = vld [vmem:[#allocation9 + $0x78] sm:$0xff] }
  0xb5   : > { %1471 = vmatprep.subr.bf16.mxu0 %v1470_v15  ;;  %v1550_v12 = vpack.c.bf16 %v656_v11, %v655_v9 }
  0xb8   : > { %1473 = vmatpush3.bf16.msra.mxu0 %v1470_v15  ;;  %v830_v15 = vld [vmem:[#allocation9 + $0x108] sm:$0xff] }
  0xb9   : > { %1475 = vmatprep.subr.bf16.mxu0 %v1474_v18  ;;  %v1554_v16 = vpack.c.bf16 %v830_v15, %v829_v14 }
  0xbc   : > { %1477 = vmatpush3.bf16.msra.mxu0 %v1474_v18  ;;  %v832_v18 = vld [vmem:[#allocation9 + $0x118] sm:$0xff] }
  0xbd   : > { %1479 = vmatprep.subr.bf16.mxu0 %v1478_v21  ;;  %v1558_v19 = vpack.c.bf16 %v832_v18, %v831_v17 }
  0xc0   : > { %1481 = vmatpush3.bf16.msra.mxu0 %v1478_v21  ;;  %v833_v21 = vld [vmem:[#allocation9 + $0x120] sm:$0xff] }
  0xc1   : > { %1483 = vmatprep.subr.bf16.mxu0 %v1482_v24 }
  0xc4   : > { %1485 = vmatpush3.bf16.msra.mxu0 %v1482_v24  ;;  %v1562_v24 = vpack.c.bf16 %v834_v22, %v833_v21 }
  0xc5   : > { %1487 = vmatprep.subr.bf16.mxu0 %v1486_v27 }
  0xc8   : > { %1489 = vmatpush3.bf16.msra.mxu0 %v1486_v27  ;;  %v1566_v27 = vpack.c.bf16 %v836_v26, %v835_v25 }
  0xcb   : > { %1287 = vmatmul.mubr.f32.vlgmr.msra.gmra.mrb[0].mxu0 %v520_v28  ;;  %v837_v28 = vld [vmem:[#allocation9 + $0x140] sm:$0xff] }
  0xcc   : > { %v1570_v30 = vpack.c.bf16 %v838_v29, %v837_v28 }
 0x19e   : > { %v1288_v45 = vpop.f32.mrb[0].mxu0 }
 0x19f   : > { %v623_v47 = vmul.f32 %v1288_v45, %v1065_v44  ;;  %v604_v48 = vpop.f32.mrb[1].mxu0 }
 0x1a0   : > { %v622_v49 = vmul.f32 %v1065_v44, %v604_v48 }
 0x1a1   : > { %v632_v50 = vadd.f32 %v1066_v46, %v623_v47 }
 0x1a2   : > { %v631_v51 = vadd.f32 %v1066_v46, %v622_v49 }
 0x1a3   : > { %v634_v54 = vmax.f32 %v632_v50, 0.0 }
 0x1a4   : > { %v633_v55 = vmax.f32 %v631_v51, 0.0 }
 0x1a5   : > { %638 = vst [vmem:[#allocation3 + $0x9] sm:$0xff] %v634_v54 }
 0x1a6   : > { %637 = vst [vmem:[#allocation3 + $0x1] sm:$0xff] %v633_v55  ;;  %1321 = vmatprep.mubr.f32.mxu1 %v633_v55 }
 0x1a7   : > { %1322 = vmatmul.mubr.f32.vlgmr.msra.gmra.mrb[0].mxu1 %v634_v54 }
 0x1a8   : > { %1525 = vmatpush3.bf16.msra.mxu1 %v1522_v43  ;;  %v1068_v43 = vld [vmem:[%s2148_s6] ss:$0 sm:$0xff] }
 0x1a9   : > { %1527 = vmatprep.subr.bf16.mxu1 %v1526_v56 }
 0x1ac   : > { %1529 = vmatpush3.bf16.msra.mxu1 %v1526_v56  ;;  %v827_v40 = vld [vmem:[#allocation3 + $0xa] sm:$0xff] }
 0x1ad   : > { %v639_v62 = vld [vmem:[#allocation3] sm:$0xff]  ;;  %1531 = vmatprep.subr.bf16.mxu1 %v1530_v59  ;;  %v640_v20 = vld [vmem:[#allocation3 + $0x8] sm:$0xff] }
 0x1ae   : > { %1356 = vmatprep.mubr.f32.mxu1 %v639_v62  ;;  %v826_v23 = vld [vmem:[#allocation3 + $0x2] sm:$0xff] }
 0x1b0   : > { %1533 = vmatpush3.bf16.msra.mxu1 %v1530_v59 }
 0x1b1   : > { %1535 = vmatprep.subr.bf16.mxu1 %v1534_v63 }
 0x1b4   : > { %1537 = vmatpush3.bf16.msra.mxu1 %v1534_v63 }
 0x1b5   : > { %1539 = vmatprep.subr.bf16.mxu1 %v1538_v2 }
 0x1b8   : > { %1541 = vmatpush3.bf16.msra.mxu1 %v1538_v2 }
 0x1b9   : > { %1543 = vmatprep.subr.bf16.mxu1 %v1542_v5 }
 0x1bc   : > { %1545 = vmatpush3.bf16.msra.mxu1 %v1542_v5 }
 0x1bd   : > { %1547 = vmatprep.subr.bf16.mxu1 %v1546_v8 }
 0x1c0   : > { %1549 = vmatpush3.bf16.msra.mxu1 %v1546_v8 }
 0x1c1   : > { %1551 = vmatprep.subr.bf16.mxu1 %v1550_v12 }
 0x1c4   : > { %1553 = vmatpush3.bf16.msra.mxu1 %v1550_v12 }
 0x1c5   : > { %1555 = vmatprep.subr.bf16.mxu1 %v1554_v16 }
 0x1c7   : > { %1357 = vmatmul.mubr.f32.vlgmr.msra.gmra.mrb[0].mxu1 %v640_v20 }
 0x1c8   : > { %1557 = vmatpush3.bf16.msra.mxu1 %v1554_v16  ;;  %1391 = vmatprep.mubr.f32.mxu1 %v826_v23 }
 0x1c9   : > { %1559 = vmatprep.subr.bf16.mxu1 %v1558_v19 }
 0x1cc   : > { %1561 = vmatpush3.bf16.msra.mxu1 %v1558_v19 }
 0x1cd   : > { %1563 = vmatprep.subr.bf16.mxu1 %v1562_v24 }
 0x1d0   : > { %1565 = vmatpush3.bf16.msra.mxu1 %v1562_v24 }
 0x1d1   : > { %1567 = vmatprep.subr.bf16.mxu1 %v1566_v27 }
 0x1d4   : > { %1569 = vmatpush3.bf16.msra.mxu1 %v1566_v27 }
 0x1d5   : > { %1571 = vmatprep.subr.bf16.mxu1 %v1570_v30 }
 0x1d8   : > { %1573 = vmatpush3.bf16.msra.mxu1 %v1570_v30 }
 0x1d9   : > { %1575 = vmatprep.subr.bf16.mxu1 %v1574_v33 }
 0x1dc   : > { %1577 = vmatpush3.bf16.msra.mxu1 %v1574_v33 }
 0x1dd   : > { %1579 = vmatprep.subr.bf16.mxu1 %v1578_v36 }
 0x1e0   : > { %1581 = vmatpush3.bf16.msra.mxu1 %v1578_v36 }
 0x1e1   : > { %1583 = vmatprep.subr.bf16.mxu1 %v1582_v39 }
 0x1e4   : > { %1585 = vmatpush3.bf16.msra.mxu1 %v1582_v39 }
 0x1e7   : > { %1392 = vmatmul.mubr.f32.vlgmr.msra.gmra.mrb[0].mxu1 %v827_v40 }
 0x2ba   : > { %v1393_v42 = vpop.f32.mrb[0].mxu1 }
 0x2bb   : > { %v930_v44 = vmul.f32 %v1393_v42, %v1067_v41  ;;  %v911_v45 = vpop.f32.mrb[1].mxu1 }
 0x2bc   : > { %v929_v46 = vmul.f32 %v1067_v41, %v911_v45 }
 0x2bd   : > { %v939_v47 = vadd.f32 %v1068_v43, %v930_v44 }
 0x2be   : > { %v938_v48 = vadd.f32 %v1068_v43, %v929_v46 }
 0x2bf   : > { %v941_v49 = vadd.f32 %v939_v47, %v2072_v13 }
 0x2c0   : > { %v940_v50 = vadd.f32 %v938_v48, %v2068_v10 }
 0x2c1   : > { %v943_v51 = vmax.f32 %v941_v49, 0.0 }
 0x2c2   : > { %v942_v52 = vmax.f32 %v940_v50, 0.0 }
 0x2c3   : > { %945 = vst [vmem:[%s325_s21 + $0x8] sm:$0xff] %v943_v51 }
 0x2c4   : > { %944 = vst [vmem:[%s325_s21] sm:$0xff] %v942_v52 }
 0x2c5   : > { %1765 = shalt.err (!%p1762_p1)
}
 0x2c6   : > { %s1766_s15 = scalar_lea.hbm %s2098_s9, 256  ;;  %s1770_s21 = scalar_lea.hbm %s2149_s7, 512 }
 0x2c7   : > { %p1767_p13 = scmp.ne.s32.totalorder %s2098_s9, %s1766_s15  ;;  %p1771_p4 = scmp.lt.u32.totalorder %s2098_s9, %s2149_s7 }
 0x2c8   : > { %p1772_p5 = scmp.lt.u32.totalorder %s1770_s21, %s1766_s15  ;;  %p1774_p11 = scmp.lt.u32.totalorder %s1766_s15, %s2098_s9 }
 0x2c9   : > { %p1768_p6 = pnand %p1767_p13, %p2165_p0 }
 0x2ca   : > { %p1773_p8 = por %p1772_p5, %p1771_p4 }
 0x2cb   : > { %p1769_p10 = pneg %p1768_p6 }
 0x2cc   : > { %p1775_p2 = por %p1774_p11, %p1773_p8 }
 0x2ce   : > { %p1776_p3 = pnand %p1775_p2, %p1769_p10 }
 0x2d0   : > { %1779 = shalt.err (!%p1776_p3)
}
 0x2d1   : > { %s1831_s30 = smov 128   ;;  %s1832_s28 = smov 8  }
 0x2d2   : > { %1604 = dma.vmem_to_hbm [thread:$0]  (%p2165_p0), %s2092_s23, 256, %s2098_s9, %s947_s22, %s1831_s30, %s1831_s30, %s1832_s28  }
 0x2d3 PF: > { %s975_s29 = sand.u32 1, %s1810_s24   ;;  %p2166_p7 = scmp.ne.s32.totalorder %s2155_s8, 0 }
 0x2d4   : > { %p2167_p9 = scmp.ge.s32.totalorder %s1822_s27, 2  ;;  %s976_s11 = scalar_lea.sflag [#allocation6], %s975_s29 }
 0x2d6   : > { %p1618_p12 = pnand %p2167_p9, %p2166_p7 }
 0x2d8   : > { %1805 = dma.done.wait (!%p1618_p12), %s976_s11, 256  }
 0x2d9   : > { %1807 = vsyncadd (!%p1618_p12), %s976_s11, 4294967040  ;;  %p21_p1 = scmp.ge.s32.totalorder %s1989_s12, 4   ;;  %s2168_s24 = smov %s1814_s25 }
 0x2da   : > { %s2169_s25 = smov %s1818_s26  ;;  %s2170_s26 = smov %s2005_s17 }
 0x2db   : > { %s2171_s27 = smov %s1989_s12  ;;  %23 = sbr.rel (!%p21_p1) target bundleno = 6 (0x6), region = 105 }
 0x2e2   :  { %981 = vsyncpa [#allocation5], 1 }
 0x2e3   :  { %983 = vsyncpa [#allocation5 + $0x1], 1 }
 0x2e4   :  { %984 = vsyncpa [#allocation8], 1 }
 0x2e5   :  { %985 = vsyncpa [#allocation6], 1 }
 0x2e6   :  { %987 = vsyncpa [#allocation6 + $0x1], 1 }

</bundles_post_ra>
